<compile_context>
chip_gen: v5e
topology: v5e:2x2
jax: 0.10.0
libtpu: 0.0.40
codegen_flags: <defaults>
</compile_context>

<pallas_src>
import jax
import jax.numpy as jnp
from jax import lax
from jax.experimental import pallas as pl
from jax.experimental.pallas import tpu as pltpu


def _mlp_forward_kernel(x_ref, w1_ref, b1_ref, w2_ref, b2_ref, o_ref):
    # x_ref : (TB, D)    f32   streamed batch tile (unpadded feature dim)
    # w1_ref: (D, Hp)    bf16  resident across the grid (Buffered(1))
    # b1_ref: (1, Hp)    f32   resident
    # w2_ref: (1, Hp)    f32   resident (W2 transposed to a row)
    # b2_ref: (1,)       f32   SMEM scalar
    # o_ref : (1, 1, TB) f32   lane-dense row per batch tile

    # In-kernel cast: f32 HBM stream, bf16 MXU operand (VPU slots are idle).
    x = x_ref[...].astype(w1_ref.dtype)

    # First layer on the MXU, fp32 accumulation.
    h = jnp.dot(x, w1_ref[...], preferred_element_type=jnp.float32)
    # fp32 epilogue on the VPU (bias + ReLU); padded hidden cols stay 0.
    h = jnp.maximum(h + b1_ref[...], 0.0)

    # Second layer: (1, Hp) contracted against (TB, Hp) over Hp -> (1, TB).
    # Transposed formulation keeps the result lane-dense (TB samples along
    # lanes) so the store is an unmasked, full-width vst.
    o = lax.dot_general(
        w2_ref[...], h,
        dimension_numbers=(((1,), (1,)), ((), ())),
        preferred_element_type=jnp.float32,
    )
    o = o + b2_ref[0]                       # fold b2 (idle VPU slot)
    o_ref[...] = o.reshape(1, 1, o.shape[-1]).astype(o_ref.dtype)


def metamodel_forward(x, w1, b1, w2, b2, *, block_batch=1024,
                      compute_dtype=jnp.bfloat16):
    """Concrete MetaModel.forward: returns per-sample scalar predictions (B,).

    block_batch: batch-tile size (rounded to a multiple of 128).  Default 1024
    targets v5e/v6e's 128 MiB VMEM; on v7x (64 MiB) large-D workloads should
    pass a smaller value (vmem_limit_bytes below is derived from the choice).
    """
    B, D = x.shape
    H = w1.shape[1]

    # Hidden dim lane-aligned (resident, tiny); feature dim left unpadded.
    Hp = pl.cdiv(H, 128) * 128

    # Batch tile: multiple of 128 (lane-dense output), and capped so that we
    # get at least 2 grid steps whenever the batch allows it (v7x megacore
    # sharding + DMA/compute pipelining on all generations).
    tb = max(128, (block_batch // 128) * 128)
    if B > 128:
        tb = min(tb, pl.cdiv(pl.cdiv(B, 2), 128) * 128)
    G = pl.cdiv(B, tb)

    # Resident operands: pad hidden dim with zeros (inert: padded units get
    # bias 0, ReLU(0)=0, weight 0 in the second layer).
    w1_p = jnp.pad(w1.astype(compute_dtype), ((0, 0), (0, Hp - H)))
    b1_p = jnp.pad(b1.astype(jnp.float32), ((0, Hp - H),)).reshape(1, Hp)
    w2_p = jnp.pad(w2[:, 0].astype(jnp.float32), ((0, Hp - H),)).reshape(1, Hp)
    b2_s = b2.astype(jnp.float32).reshape(1)

    itemsize_x = jnp.dtype(x.dtype).itemsize
    itemsize_c = jnp.dtype(compute_dtype).itemsize

    # Explicit VMEM budget: double-buffered x tile + single-buffered resident
    # weights + double-buffered output row + the h intermediate, plus slack.
    vmem_need = (2 * tb * D * itemsize_x
                 + D * Hp * itemsize_c
                 + 2 * Hp * 4
                 + 2 * tb * 4
                 + tb * Hp * 4)
    vmem_limit = int(min(120 << 20, max(32 << 20, vmem_need + (8 << 20))))

    cost = pl.CostEstimate(
        flops=2 * B * D * Hp + 2 * B * Hp,
        transcendentals=0,
        bytes_accessed=(B * D * itemsize_x + D * Hp * itemsize_c
                        + 2 * Hp * 4 + G * tb * 4 + 4),
    )

    out = pl.pallas_call(
        _mlp_forward_kernel,
        out_shape=jax.ShapeDtypeStruct((G, 1, tb), jnp.float32),
        grid_spec=pltpu.PrefetchScalarGridSpec(
            num_scalar_prefetch=0,
            grid=(G,),
            in_specs=[
                # x: one batch tile per grid step, unpadded feature dim
                # (last block dim == full array dim is legal); the ragged
                # tail tile's OOB rows only affect sliced-off output lanes.
                pl.BlockSpec((tb, D), lambda i: (i, 0)),
                # Resident weights / biases: constant block index, single
                # buffer (no point double-buffering a block that never moves).
                pl.BlockSpec((D, Hp), lambda i: (0, 0),
                             pipeline_mode=pl.Buffered(1)),
                pl.BlockSpec((1, Hp), lambda i: (0, 0),
                             pipeline_mode=pl.Buffered(1)),
                pl.BlockSpec((1, Hp), lambda i: (0, 0),
                             pipeline_mode=pl.Buffered(1)),
                # b2: scalar in SMEM, folded in the kernel epilogue.
                pl.BlockSpec(memory_space=pltpu.MemorySpace.SMEM),
            ],
            # Lane-dense (1, 1, tb) row per step.
            out_specs=pl.BlockSpec((1, 1, tb), lambda i: (i, 0, 0)),
        ),
        compiler_params=pltpu.CompilerParams(
            dimension_semantics=("parallel",),   # batch tiles are independent
            vmem_limit_bytes=vmem_limit,
        ),
        cost_estimate=cost,
    )(x, w1_p, b1_p, w2_p, b2_s)

    # Drop tail padding lanes; each valid lane depends only on its own row.
    return out.reshape(G * tb)[:B]


if __name__ == "__main__":
    # Small shapes consistent with the module's usage: a batch of samples,
    # a feature vector per sample, one scalar prediction per sample.
    # B is intentionally not a multiple of the tile so the ragged-tail path
    # and multiple grid steps (pipelining / megacore) are exercised.
    B, D, H = 300, 48, 96

    key = jax.random.PRNGKey(0)
    kx, kw1, kb1, kw2, kb2 = jax.random.split(key, 5)

    x = jax.random.normal(kx, (B, D), dtype=jnp.float32)
    w1 = jax.random.normal(kw1, (D, H), dtype=jnp.float32) * (1.0 / jnp.sqrt(D))
    b1 = jax.random.normal(kb1, (H,), dtype=jnp.float32) * 0.01
    w2 = jax.random.normal(kw2, (H, 1), dtype=jnp.float32) * (1.0 / jnp.sqrt(H))
    b2 = jax.random.normal(kb2, (1,), dtype=jnp.float32) * 0.01

    # block_batch=128 -> tb=128, 3 grid steps at this demo size.
    pred = metamodel_forward(x, w1, b1, w2, b2,
                             block_batch=128, compute_dtype=jnp.bfloat16)
    pred = jax.block_until_ready(pred)

    # Pure-JAX reference with matching numerics (bf16 operands for the first
    # matmul, fp32 accumulation/epilogue, fp32 second layer).
    xb = x.astype(jnp.bfloat16)
    w1b = w1.astype(jnp.bfloat16)
    h_ref = jnp.maximum(
        jnp.dot(xb, w1b, preferred_element_type=jnp.float32) + b1, 0.0)
    pred_ref = jnp.sum(h_ref * w2[:, 0], axis=-1) + b2[0]

    assert pred.shape == (B,)
    assert jnp.allclose(pred, pred_ref, atol=5e-2, rtol=5e-2), (
        float(jnp.max(jnp.abs(pred - pred_ref))))

    print("KERNEL_OK")
</pallas_src>

<mosaic_0001>
module attributes {stable_mosaic.version = 11 : i64} {
  func.func @_mlp_forward_kernel(%arg0: i32, %arg1: memref<128x48xf32, #tpu.memory_space<vmem>>, %arg2: memref<48x128xbf16, #tpu.memory_space<vmem>>, %arg3: memref<1x128xf32, #tpu.memory_space<vmem>>, %arg4: memref<1x128xf32, #tpu.memory_space<vmem>>, %arg5: memref<1xf32, #tpu.memory_space<smem>>, %arg6: memref<1x1x128xf32, #tpu.memory_space<vmem>>) attributes {dimension_semantics = [#tpu.dimension_semantics<parallel>], iteration_bounds = array<i64: 3>, scalar_prefetch = 0 : i64, scratch_operands = 0 : i64, tpu.core_type = #tpu.core_type<tc>, window_params = [{transform_indices = @transform_0, window_bounds = array<i64: 128, 48>}, {pipeline_mode = #tpu.pipeline_mode<synchronous>, transform_indices = @transform_1, window_bounds = array<i64: 48, 128>}, {pipeline_mode = #tpu.pipeline_mode<synchronous>, transform_indices = @transform_2, window_bounds = array<i64: 1, 128>}, {pipeline_mode = #tpu.pipeline_mode<synchronous>, transform_indices = @transform_3, window_bounds = array<i64: 1, 128>}, {transform_indices = @transform_4, window_bounds = array<i64: 1>}, {transform_indices = @transform_5, window_bounds = array<i64: 1, 1, 128>}]} {
    %c0 = arith.constant 0 : index
    %c0_0 = arith.constant 0 : index
    %0 = vector.load %arg1[%c0, %c0_0] : memref<128x48xf32, #tpu.memory_space<vmem>>, vector<128x48xf32>
    %1 = arith.truncf %0 : vector<128x48xf32> to vector<128x48xbf16>
    %c0_1 = arith.constant 0 : index
    %c0_2 = arith.constant 0 : index
    %2 = vector.load %arg2[%c0_1, %c0_2] : memref<48x128xbf16, #tpu.memory_space<vmem>>, vector<48x128xbf16>
    %cst = arith.constant dense<0.000000e+00> : vector<128x128xf32>
    %3 = tpu.matmul %1, %2, %cst {dimension_numbers = #tpu.dot_dimension_numbers<[1], [0], [0], [1], [0, 0, 1, 1], [], []>} : vector<128x48xbf16>, vector<48x128xbf16>, vector<128x128xf32> -> vector<128x128xf32>
    %c0_3 = arith.constant 0 : index
    %c0_4 = arith.constant 0 : index
    %4 = vector.load %arg3[%c0_3, %c0_4] : memref<1x128xf32, #tpu.memory_space<vmem>>, vector<1x128xf32>
    %5 = vector.broadcast %4 : vector<1x128xf32> to vector<128x128xf32>
    %6 = arith.addf %3, %5 : vector<128x128xf32>
    %cst_5 = arith.constant 0.000000e+00 : f32
    %7 = vector.broadcast %cst_5 : f32 to vector<128x128xf32>
    %8 = arith.maximumf %6, %7 : vector<128x128xf32>
    %c0_6 = arith.constant 0 : index
    %c0_7 = arith.constant 0 : index
    %9 = vector.load %arg4[%c0_6, %c0_7] : memref<1x128xf32, #tpu.memory_space<vmem>>, vector<1x128xf32>
    %cst_8 = arith.constant dense<0.000000e+00> : vector<1x128xf32>
    %10 = tpu.matmul %9, %8, %cst_8 {dimension_numbers = #tpu.dot_dimension_numbers<[1], [1], [0], [0], [0, 0, 1, 0], [], []>} : vector<1x128xf32>, vector<128x128xf32>, vector<1x128xf32> -> vector<1x128xf32>
    %c0_9 = arith.constant 0 : index
    %11 = memref.load %arg5[%c0_9] : memref<1xf32, #tpu.memory_space<smem>>
    %12 = vector.broadcast %11 : f32 to vector<1x128xf32>
    %13 = arith.addf %10, %12 : vector<1x128xf32>
    %14 = vector.shape_cast %13 : vector<1x128xf32> to vector<1x1x128xf32>
    %c0_10 = arith.constant 0 : index
    %c0_11 = arith.constant 0 : index
    %c0_12 = arith.constant 0 : index
    %15 = vector.load %arg6[%c0_10, %c0_11, %c0_12] : memref<1x1x128xf32, #tpu.memory_space<vmem>>, vector<1x1x128xf32>
    tpu.vector_store %arg6[%c0_10, %c0_11, %c0_12], %14 {strides = array<i32>} : memref<1x1x128xf32, #tpu.memory_space<vmem>>, vector<1x1x128xf32>,
    return
  }
  func.func @transform_0(%arg0: i32) -> (i32, i32) {
    %c0_i32 = arith.constant 0 : i32
    %c0_i32_0 = arith.constant 0 : i32
    return %arg0, %c0_i32 : i32, i32
  }
  func.func @transform_1(%arg0: i32) -> (i32, i32) {
    %c0_i32 = arith.constant 0 : i32
    %c0_i32_0 = arith.constant 0 : i32
    %c0_i32_1 = arith.constant 0 : i32
    return %c0_i32, %c0_i32_0 : i32, i32
  }
  func.func @transform_2(%arg0: i32) -> (i32, i32) {
    %c0_i32 = arith.constant 0 : i32
    %c0_i32_0 = arith.constant 0 : i32
    %c0_i32_1 = arith.constant 0 : i32
    return %c0_i32, %c0_i32_0 : i32, i32
  }
  func.func @transform_3(%arg0: i32) -> (i32, i32) {
    %c0_i32 = arith.constant 0 : i32
    %c0_i32_0 = arith.constant 0 : i32
    %c0_i32_1 = arith.constant 0 : i32
    return %c0_i32, %c0_i32_0 : i32, i32
  }
  func.func @transform_4(%arg0: i32) -> i32 {
    %c0_i32 = arith.constant 0 : i32
    %c0_i32_0 = arith.constant 0 : i32
    return %c0_i32 : i32
  }
  func.func @transform_5(%arg0: i32) -> (i32, i32, i32) {
    %c0_i32 = arith.constant 0 : i32
    %c0_i32_0 = arith.constant 0 : i32
    %c0_i32_1 = arith.constant 0 : i32
    return %arg0, %c0_i32, %c0_i32_0 : i32, i32, i32
  }
}

</mosaic_0001>

<bundles_post_ra>
// kernel: tpu_custom_call.1
= control target key start
LH: loop header
LB: loop body
LE: loop exit
PB: predicated region body
PF: predicated region fallthrough
CT: control target
= control target key end

     0   :  { %s779_s0 = inlined_call_operand.vmem [shape: f32[300,48], index: 0, kind: input, shape index: {}]   ;;  %s780_s1 = inlined_call_operand.vmem [shape: bf16[48,128], index: 1, kind: input, shape index: {}]   ;;  %s781_s2 = inlined_call_operand.vmem [shape: f32[1,128], index: 2, kind: input, shape index: {}]   ;;  %s782_s3 = inlined_call_operand.vmem [shape: f32[1,128], index: 3, kind: input, shape index: {}]   ;;  %s783_s4 = inlined_call_operand.<no memory space> [shape: f32[1], index: 4, kind: input, shape index: {}]   ;;  %s784_s5 = inlined_call_operand.hbm [shape: f32[3,1,128], index: 5, kind: output, shape index: {}]  }
   0x1   :  { %10 = sst [smem:[#allocation2]] %s783_s4 }
   0x2   :  { %11 = vsyncpa [#allocation4], 0 }
   0x3   :  { %13 = vsyncpa [#allocation4 + $0x1], 0  ;;  %s654_s20 = smov 0   ;;  %s656_s21 = smov 0  }
   0x4   :  { %s658_s22 = smov 0   ;;  %s660_s23 = smov 0  }
   0x5 LB: > { %s675_s4 = sadd.s32 4294967295, %s619_s23   ;;  %s480_s24 = sadd.s32 4294967294, %s619_s23   ;;  %s619_s23 = sphi %s660_s23, %s790_s23   ;;  %s615_s22 = sphi %s658_s22, %s789_s22   ;;  %s611_s21 = sphi %s656_s21, %s788_s21   ;;  %s607_s20 = sphi %s654_s20, %s787_s20  }
   0x6   : > { %s679_s25 = sadd.s32 1, %s619_s23   ;;  %s136_s26 = sadd.s32 1, %s615_s22 }
   0x7   : > { %s133_s27 = ssub.s32 %s619_s23, %s679_s25  ;;  %p146_p0 = scmp.ne.s32.totalorder %s615_s22, %s611_s21 }
   0x8   : > { %p134_p1 = scmp.eq.s32.totalorder %s133_s27, 0  ;;  %p147_p2 = scmp.eq.s32.totalorder %s675_s4, 2 }
   0x9   : > { %p152_p3 = scmp.ne.s32.totalorder %s611_s21, %s607_s20  ;;  %p153_p4 = scmp.eq.s32.totalorder %s480_s24, 2 }
   0xa   : > { %s690_s28 = scalar_select %p134_p1, %s615_s22, %s136_s26  }
   0xb   : > { %p692_p5 = por %p147_p2, %p146_p0  ;;  %p696_p6 = por %p153_p4, %p152_p3 }
   0xc   : > { %p483_p7 = scmp.ge.s32.totalorder %s619_s23, 1  ;;  %p200_p8 = scmp.lt.s32.totalorder %s619_s23, 4 }
   0xe   : > { %p201_p9 = pnand %p483_p7, %p200_p8 }
   0xf   : > { %s484_s8 = sshll.u32 (!%p201_p9), %s675_s4, 4  ;;  %s389_s26 = sld [smem:[#allocation2]] (!%p201_p9) }
  0x10   : > { %204 = sbr.rel (%p201_p9) target bundleno = 387 (0x183), region = 40  ;;  %p236_p10 = scmp.lt.s32.totalorder (!%p201_p9), %s484_s8, 37 }
  0x11   : > { %s229_s27 = sand.u32 (!%p201_p9), 1, %s611_s21  }
  0x12   : > { %s230_s9 = scalar_lea.vmem (!%p201_p9), [#allocation3], %s229_s27  ;;  %s413_s12 = scalar_lea.sflag (!%p201_p9), [#allocation4], %s229_s27 }
  0x13   : > { %s423_s10 = sshll.u32 (!%p201_p9), %s230_s9, 4  ;;  %s424_s10 = int_to_ptr.vmem [resolvable:$true] %s423_s10 }
  0x15   : > { %v510_v0 = vld [vmem:[%s780_s1 + $0x10] sm:$0xff]  ;;  %v509_v1 = vld [vmem:[%s780_s1 + $0x8] sm:$0xff]  ;;  %s792_s8 = smov (!%p236_p10, %s484_s8), 37  ;;  %v508_v2 = vld [vmem:[%s780_s1] sm:$0xff]  ;;  %vm298_vm0 = vcmask 392192  }
  0x16   : > { %511 = vmatpush.bf16.msra.mxu2 %v510_v0  ;;  %512 = vmatpush.bf16.msra.mxu3 %v510_v0  ;;  %s485_s11 = sshll.u32 %s792_s8, 3  ;;  %v556_v35 = vld [vmem:[%s781_s2] ss:$0 sm:$0xff]  ;;  %s421_s8 = scalar_lea.hbm %s784_s5, %s675_s4 }
  0x17   : > { %328 = vmatpush.bf16.msra.mxu0 %v510_v0  ;;  %s715_s16 = scalar_lea.vmem %s779_s0, %s485_s11  ;;  %s425_s11 = sshll.u32 %s421_s8, 4  ;;  %s426_s11 = int_to_ptr.hbm [resolvable:$true] %s425_s11 }
  0x18   : > { %v252_v3 = vld [vmem:[%s715_s16 + $0x30] sm:$0xff]  ;;  %v253_v4 = vld [vmem:[%s715_s16 + $0x38] sm:$0xff]  ;;  %v258_v5 = vld [vmem:[%s715_s16 + $0x60] sm:$0xff]  ;;  %s571_s13 = sshra.s32 %s426_s11, 4  ;;  %s577_s4 = scalar_lea.hbm %s784_s5, 3  ;;  %s572_s13 = int_to_ptr.hbm [resolvable:$true] %s571_s13 }
  0x19   : > { %v259_v6 = vld [vmem:[%s715_s16 + $0x68] sm:$0xff]  ;;  %v265_v7 = vpack.c.bf16 %v253_v4, %v252_v3  ;;  %v246_v9 = vld [vmem:[%s715_s16] sm:$0xff]  ;;  %v260_v14 = vld [vmem:[%s715_s16 + $0x70] sm:$0xff]  ;;  %s573_s14 = scalar_lea.hbm %s572_s13, 1  ;;  %p578_p0 = scmp.lt.s32.totalorder %s572_s13, %s784_s5 }
  0x1a   : > { %513 = vmatpush.bf16.msra.mxu2 %v509_v1  ;;  %514 = vmatpush.bf16.msra.mxu3 %v509_v1  ;;  %v268_v8 = vpack.c.bf16 %v259_v6, %v258_v5  ;;  %v247_v10 = vld [vmem:[%s715_s16 + $0x8] sm:$0xff]  ;;  %v254_v12 = vld [vmem:[%s715_s16 + $0x40] sm:$0xff]  ;;  %v261_v15 = vld [vmem:[%s715_s16 + $0x78] sm:$0xff]  ;;  %p574_p11 = scmp.ne.s32.totalorder %s572_s13, %s573_s14  ;;  %p579_p1 = scmp.lt.s32.totalorder %s577_s4, %s573_s14 }
  0x1b   : > { %329 = vmatpush.bf16.msra.mxu0 %v509_v1  ;;  %v262_v11 = vpack.c.bf16 %v247_v10, %v246_v9  ;;  %v255_v13 = vld [vmem:[%s715_s16 + $0x48] sm:$0xff]  ;;  %v248_v16 = vld [vmem:[%s715_s16 + $0x10] sm:$0xff]  ;;  %v249_v17 = vld [vmem:[%s715_s16 + $0x18] sm:$0xff]  ;;  %v269_v19 = vpack.c.bf16 %v261_v15, %v260_v14 }
  0x1c   : > { %v266_v18 = vpack.c.bf16 %v255_v13, %v254_v12  ;;  %v263_v20 = vpack.c.bf16 %v249_v17, %v248_v16  ;;  %v256_v21 = vld [vmem:[%s715_s16 + $0x50] sm:$0xff]  ;;  %v257_v22 = vld [vmem:[%s715_s16 + $0x58] sm:$0xff]  ;;  %v250_v23 = vld [vmem:[%s715_s16 + $0x20] sm:$0xff]  ;;  %v390_v13 = vstv %s389_s26  ;;  %p575_p12 = pnand %p574_p11, %p692_p5  ;;  %p580_p2 = por %p579_p1, %p578_p0 }
  0x1d   : > { %v251_v24 = vld [vmem:[%s715_s16 + $0x28] sm:$0xff]  ;;  %v267_v25 = vpack.c.bf16 %v257_v22, %v256_v21  ;;  %v388_v12 = vld [vmem:[%s782_s3] sm:$0x1] }
  0x1e   : > { %515 = vmatpush.bf16.msra.mxu2 %v508_v2  ;;  %516 = vmatpush.bf16.msra.mxu3 %v508_v2  ;;  %v264_v26 = vpack.c.bf16 %v251_v24, %v250_v23  ;;  %p576_p13 = pneg %p575_p12 }
  0x1f   : > { %330 = vmatpush.bf16.msra.mxu0 %v508_v2 }
  0x20   : > { %p581_p3 = pnand %p580_p2, %p576_p13 }
  0x21   : > { %501 = vmatmul.msk.bf16.vlgmr.msra.gmra.mxu2 %vm298_vm0, %v265_v7  ;;  %504 = vmatmul.msk.bf16.vlgmr.msra.gmra.mxu3 %vm298_vm0, %v268_v8 }
  0x22   : > { %498 = vmatmul.msk.bf16.vlgmr.msra.gmra.mxu0 %vm298_vm0, %v262_v11 }
  0x31   : > { %502 = vmatmul.msk.bf16.gmra.mxu2 %vm298_vm0, %v266_v18  ;;  %505 = vmatmul.msk.bf16.gmra.mxu3 %vm298_vm0, %v269_v19 }
  0x32   : > { %499 = vmatmul.msk.bf16.gmra.mxu0 %vm298_vm0, %v263_v20 }
  0x41   : > { %503 = vmatmul.msk.bf16.gmra.mxu2 %vm298_vm0, %v267_v25 }
  0x42   : > { %500 = vmatmul.msk.bf16.gmra.mxu0 %vm298_vm0, %v264_v26 }
  0x9f   : > { %v332_v31 = vpop.f32.mrf.mxu0 }
  0xa0   : > { %v333_v9 = vadd.f32 %v556_v35, %v332_v31 }
  0xa2   : > { %v372_v11 = vmax.f32 %v333_v9, 0.0 }
  0xa4   : > { %v347_v27 = vpop.f32.mrf.mxu2  ;;  %v362_v28 = vpop.f32.mrf.mxu3 }
  0xa5   : > { %v363_v45 = vadd.f32 %v556_v35, %v362_v28  ;;  %v348_v60 = vadd.f32 %v556_v35, %v347_v27 }
  0xa7   : > { %v334_v34 = vpop.f32.mrf.mxu0  ;;  %v384_v47 = vmax.f32 %v363_v45, 0.0  ;;  %v378_v63 = vmax.f32 %v348_v60, 0.0 }
  0xa8   : > { %v335_v7 = vadd.f32 %v556_v35, %v334_v34 }
  0xaa   : > { %v373_v10 = vmax.f32 %v335_v7, 0.0 }
  0xac   : > { %v349_v29 = vpop.f32.mrf.mxu2  ;;  %v364_v30 = vpop.f32.mrf.mxu3 }
  0xad   : > { %v365_v42 = vadd.f32 %v556_v35, %v364_v30  ;;  %v350_v58 = vadd.f32 %v556_v35, %v349_v29 }
  0xaf   : > { %v337_v41 = vpop.f32.mrf.mxu0  ;;  %v385_v46 = vmax.f32 %v365_v42, 0.0  ;;  %v379_v61 = vmax.f32 %v350_v58, 0.0 }
  0xb0   : > { %v338_v5 = vadd.f32 %v556_v35, %v337_v41 }
  0xb2   : > { %v374_v8 = vmax.f32 %v338_v5, 0.0 }
  0xb4   : > { %v352_v32 = vpop.f32.mrf.mxu2  ;;  %v367_v33 = vpop.f32.mrf.mxu3 }
  0xb5   : > { %v368_v39 = vadd.f32 %v556_v35, %v367_v33  ;;  %v353_v56 = vadd.f32 %v556_v35, %v352_v32 }
  0xb7   : > { %v386_v43 = vmax.f32 %v368_v39, 0.0  ;;  %v339_v48 = vpop.f32.mrf.mxu0  ;;  %v380_v59 = vmax.f32 %v353_v56, 0.0 }
  0xb8   : > { %v340_v3 = vadd.f32 %v556_v35, %v339_v48 }
  0xba   : > { %v375_v6 = vmax.f32 %v340_v3, 0.0 }
  0xbc   : > { %v354_v36 = vpop.f32.mrf.mxu2  ;;  %v369_v37 = vpop.f32.mrf.mxu3 }
  0xbd   : > { %v370_v38 = vadd.f32 %v556_v35, %v369_v37  ;;  %v355_v53 = vadd.f32 %v556_v35, %v354_v36 }
  0xbf   : > { %v387_v40 = vmax.f32 %v370_v38, 0.0  ;;  %v342_v55 = vpop.f32.mrf.mxu0  ;;  %v381_v57 = vmax.f32 %v355_v53, 0.0 }
  0xc0   : > { %v343_v1 = vadd.f32 %v556_v35, %v342_v55 }
  0xc1   : > { %391 = vmatpush.xpose.msra.mxu1 %v387_v40 }
  0xc2   : > { %v376_v4 = vmax.f32 %v343_v1, 0.0 }
  0xc4   : > { %v357_v44 = vpop.f32.mrf.mxu2 }
  0xc5   : > { %392 = vmatpush.xpose.msra.mxu1 %v386_v43  ;;  %v358_v51 = vadd.f32 %v556_v35, %v357_v44 }
  0xc7   : > { %v382_v54 = vmax.f32 %v358_v51, 0.0  ;;  %v344_v62 = vpop.f32.mrf.mxu0 }
  0xc8   : > { %v345_v0 = vadd.f32 %v556_v35, %v344_v62 }
  0xc9   : > { %393 = vmatpush.xpose.msra.mxu1 %v385_v46 }
  0xca   : > { %v377_v2 = vmax.f32 %v345_v0, 0.0 }
  0xcc   : > { %v359_v49 = vpop.f32.mrf.mxu2 }
  0xcd   : > { %v360_v50 = vadd.f32 %v556_v35, %v359_v49  ;;  %394 = vmatpush.xpose.msra.mxu1 %v384_v47 }
  0xcf   : > { %v383_v52 = vmax.f32 %v360_v50, 0.0 }
  0xd1   : > { %395 = vmatpush.xpose.msra.mxu1 %v383_v52 }
  0xd5   : > { %396 = vmatpush.xpose.msra.mxu1 %v382_v54 }
  0xd9   : > { %397 = vmatpush.xpose.msra.mxu1 %v381_v57 }
  0xdd   : > { %398 = vmatpush.xpose.msra.mxu1 %v380_v59 }
  0xe1   : > { %399 = vmatpush.xpose.msra.mxu1 %v379_v61 }
  0xe5   : > { %400 = vmatpush.xpose.msra.mxu1 %v378_v63 }
  0xe9   : > { %401 = vmatpush.xpose.msra.mxu1 %v377_v2 }
  0xed   : > { %402 = vmatpush.xpose.msra.mxu1 %v376_v4 }
  0xf1   : > { %403 = vmatpush.xpose.msra.mxu1 %v375_v6 }
  0xf5   : > { %404 = vmatpush.xpose.msra.mxu1 %v374_v8 }
  0xf9   : > { %405 = vmatpush.xpose.msra.mxu1 %v373_v10 }
  0xfd   : > { %406 = vmatpush.xpose.msra.mxu1 %v372_v11 }
 0x100   : > { %407 = vmatmul.f32.vlgmr.msra.gmra.mxu1 %v388_v12 }
 0x17d   : > { %v408_v14 = vpop.f32.mrf.mxu1 }
 0x17e   : > { %v409_v15 = vadd.f32 %v408_v14, %v390_v13 }
 0x180   : > { %411 = vst [vmem:[%s230_s9] sm:$0x1] %v409_v15 }
 0x181   : > { %584 = shalt.err (!%p581_p3)
}
 0x182   : > { %517 = dma.vmem_to_hbm [thread:$0]  (%p692_p5), %s424_s10, 16, %s426_s11, %s413_s12  }
 0x183 PF: > { %p523_p4 = scmp.ge.s32.totalorder %s619_s23, 2  ;;  %s437_s19 = sand.u32 1, %s607_s20  }
 0x184   : > { %s438_s24 = scalar_lea.sflag [#allocation4], %s437_s19 }
 0x185   : > { %p520_p7 = pnand %p523_p4, %p696_p6 }
 0x187   : > { %p521_p8 = pneg %p520_p7 }
 0x189   : > { %602 = dma.done.wait (%p521_p8), %s438_s24, 16  }
 0x18a   : > { %604 = vsyncadd (%p521_p8), %s438_s24, 4294967280  ;;  %p16_p9 = scmp.ge.s32.totalorder %s679_s25, 5   ;;  %s787_s20 = smov %s611_s21 }
 0x18b   : > { %s788_s21 = smov %s615_s22  ;;  %s789_s22 = smov %s690_s28 }
 0x18c   : > { %s790_s23 = smov %s679_s25  ;;  %18 = sbr.rel (!%p16_p9) target bundleno = 5 (0x5), region = 75 }
 0x191   :  { %443 = vsyncpa [#allocation4], 1 }
 0x192   :  { %445 = vsyncpa [#allocation4 + $0x1], 1 }

</bundles_post_ra>
